<compile_context>
chip_gen: v5e
topology: v5e:2x2
jax: 0.10.0
libtpu: 0.0.40
codegen_flags: <defaults>
</compile_context>

<pallas_src>
import jax
import jax.numpy as jnp
from jax.experimental import pallas as pl
from jax.experimental.pallas import tpu as pltpu

_LANE = 128


def _round_up(x, m):
    return (x + m - 1) // m * m


def decoder_kernel(x_ref, w1_ref, b1_ref, w2_ref, b2_ref, w3_ref, b3_ref,
                   w4_ref, b4_ref, o_ref):
    # Fused 4-layer MLP: matmuls hit the MXU (f32 accumulation), ReLU on VPU.
    # NOTE: the last grid step may be a ragged (partial) batch block; its
    # trailing rows hold unspecified data. That is safe because every op here
    # is row-independent and Pallas masks stores of out-of-range rows.
    # Do NOT add batch-axis reductions to this kernel.
    x = x_ref[...]
    h = jnp.dot(x, w1_ref[...], preferred_element_type=jnp.float32) + b1_ref[...]
    h = jnp.maximum(h, 0.0)
    h = jnp.dot(h, w2_ref[...], preferred_element_type=jnp.float32) + b2_ref[...]
    h = jnp.maximum(h, 0.0)
    h = jnp.dot(h, w3_ref[...], preferred_element_type=jnp.float32) + b3_ref[...]
    h = jnp.maximum(h, 0.0)
    out = jnp.dot(h, w4_ref[...], preferred_element_type=jnp.float32) + b4_ref[...]
    o_ref[...] = out.astype(o_ref.dtype)


def _choose_block(B, block_b):
    """Pick the batch tile.

    * B <= 256: one full-batch block (block == array dim, always a legal
      block shape even when B is not a multiple of 8).
    * Larger B: a big 256-aligned tile, capped so there are at least 2 grid
      steps -> both TensorCores get work on v7x (harmless 1-extra-step cost
      on single-TC v5e/v6e).
    """
    if B <= 256:
        return B
    half = _round_up(-(-B // 2), 256)          # ceil(B/2) rounded up to 256
    return max(256, min(block_b, half))


def _vmem_limit_bytes(block):
    # Last dims (32 / 64 / num_classes) are lane-padded to 128 in VMEM, so any
    # (block, <=128) tile costs block*128*4 bytes regardless of logical width.
    tile = block * _LANE * 4
    est = 2 * tile          # double-buffered x tile
    est += 2 * tile         # double-buffered out tile
    est += 3 * tile         # h1/h2/h3 intermediates (generous)
    est += 1 << 20          # weights/biases + slack
    try:
        phys = int(pltpu.get_tpu_info().vmem_capacity_bytes)
    except Exception:
        phys = 64 << 20     # conservative: v7x has 64 MiB per TensorCore
    return int(min(max(est, 32 << 20), int(phys * 0.75)))


def decoder_forward(x, params, *, block_b=8192):
    """x: [B, 32] float32. Returns [B, num_classes] float32."""
    w1, b1, w2, b2, w3, b3, w4, b4 = params
    B, d_in = x.shape
    assert d_in == 32
    num_classes = w4.shape[1]

    block = _choose_block(B, block_b)
    grid = (pl.cdiv(B, block),)   # ragged last block: stores masked by Pallas

    # Weights / biases are tiny (~11 KB total): constant block indices keep
    # them VMEM-resident across all grid steps (fetched once, not per step).
    full = lambda shape: pl.BlockSpec(shape, lambda i: (0,) * len(shape))

    flops = 2 * B * (32 * 64 + 64 * 64 + 64 * 32 + 32 * num_classes)
    weight_bytes = 4 * (32 * 64 + 64 + 64 * 64 + 64 + 64 * 32 + 32
                        + 32 * num_classes + num_classes)
    bytes_accessed = 4 * B * (32 + num_classes) + weight_bytes

    out = pl.pallas_call(
        decoder_kernel,
        out_shape=jax.ShapeDtypeStruct((B, num_classes), jnp.float32),
        grid_spec=pltpu.PrefetchScalarGridSpec(
            num_scalar_prefetch=0,
            grid=grid,
            in_specs=[
                pl.BlockSpec((block, 32), lambda i: (i, 0)),       # x tile
                full((32, 64)), full((1, 64)),                     # layer 1
                full((64, 64)), full((1, 64)),                     # layer 2
                full((64, 32)), full((1, 32)),                     # layer 3
                full((32, num_classes)), full((1, num_classes)),   # layer 4
            ],
            out_specs=pl.BlockSpec((block, num_classes), lambda i: (i, 0)),
        ),
        compiler_params=pltpu.CompilerParams(
            dimension_semantics=("parallel",),
            vmem_limit_bytes=_vmem_limit_bytes(block),
        ),
        cost_estimate=pl.CostEstimate(
            flops=flops, transcendentals=0, bytes_accessed=bytes_accessed),
    )(x, w1, b1, w2, b2, w3, b3, w4, b4)

    return out


def init_params(key, num_classes):
    """Deterministic init mimicking nn.Linear's uniform(-1/sqrt(fan_in), ...)."""
    dims = [(32, 64), (64, 64), (64, 32), (32, num_classes)]
    params = []
    for fan_in, fan_out in dims:
        kw, kb, key = jax.random.split(key, 3)
        bound = 1.0 / jnp.sqrt(fan_in)
        w = jax.random.uniform(kw, (fan_in, fan_out), jnp.float32, -bound, bound)
        b = jax.random.uniform(kb, (1, fan_out), jnp.float32, -bound, bound)
        params += [w, b]
    return tuple(params)


def reference_forward(x, params):
    w1, b1, w2, b2, w3, b3, w4, b4 = params
    h = jax.nn.relu(x @ w1 + b1)
    h = jax.nn.relu(h @ w2 + b2)
    h = jax.nn.relu(h @ w3 + b3)
    return h @ w4 + b4


if __name__ == "__main__":
    key = jax.random.PRNGKey(0)
    kx, kp = jax.random.split(key)

    num_classes = 2   # adult dataset -> binary classification head
    params = init_params(kp, num_classes)

    # Small-batch path (single full-batch block, grid=(1,)).
    B = 16
    x = jax.random.normal(kx, (B, 32), jnp.float32)
    out = jax.block_until_ready(decoder_forward(x, params))
    ref = reference_forward(x, params)
    assert out.shape == (B, num_classes)
    assert jnp.allclose(out, ref, atol=1e-5, rtol=1e-5), "mismatch vs reference"

    # Ragged-batch path (grid=(2,), masked partial last block, no padding).
    B2 = 300
    x2 = jax.random.normal(kx, (B2, 32), jnp.float32)
    out2 = jax.block_until_ready(decoder_forward(x2, params))
    ref2 = reference_forward(x2, params)
    assert out2.shape == (B2, num_classes)
    assert jnp.allclose(out2, ref2, atol=1e-5, rtol=1e-5), "mismatch (ragged)"

    print("KERNEL_OK")
</pallas_src>

<mosaic_0001>
module attributes {stable_mosaic.version = 11 : i64} {
  func.func @decoder_kernel(%arg0: i32, %arg1: memref<16x32xf32, #tpu.memory_space<vmem>>, %arg2: memref<32x64xf32, #tpu.memory_space<vmem>>, %arg3: memref<1x64xf32, #tpu.memory_space<vmem>>, %arg4: memref<64x64xf32, #tpu.memory_space<vmem>>, %arg5: memref<1x64xf32, #tpu.memory_space<vmem>>, %arg6: memref<64x32xf32, #tpu.memory_space<vmem>>, %arg7: memref<1x32xf32, #tpu.memory_space<vmem>>, %arg8: memref<32x2xf32, #tpu.memory_space<vmem>>, %arg9: memref<1x2xf32, #tpu.memory_space<vmem>>, %arg10: memref<16x2xf32, #tpu.memory_space<vmem>>) attributes {dimension_semantics = [#tpu.dimension_semantics<parallel>], iteration_bounds = array<i64: 1>, scalar_prefetch = 0 : i64, scratch_operands = 0 : i64, tpu.core_type = #tpu.core_type<tc>, window_params = [{transform_indices = @transform_0, window_bounds = array<i64: 16, 32>}, {pipeline_mode = #tpu.pipeline_mode<synchronous>, transform_indices = @transform_1, window_bounds = array<i64: 32, 64>}, {pipeline_mode = #tpu.pipeline_mode<synchronous>, transform_indices = @transform_2, window_bounds = array<i64: 1, 64>}, {pipeline_mode = #tpu.pipeline_mode<synchronous>, transform_indices = @transform_3, window_bounds = array<i64: 64, 64>}, {pipeline_mode = #tpu.pipeline_mode<synchronous>, transform_indices = @transform_4, window_bounds = array<i64: 1, 64>}, {pipeline_mode = #tpu.pipeline_mode<synchronous>, transform_indices = @transform_5, window_bounds = array<i64: 64, 32>}, {pipeline_mode = #tpu.pipeline_mode<synchronous>, transform_indices = @transform_6, window_bounds = array<i64: 1, 32>}, {pipeline_mode = #tpu.pipeline_mode<synchronous>, transform_indices = @transform_7, window_bounds = array<i64: 32, 2>}, {pipeline_mode = #tpu.pipeline_mode<synchronous>, transform_indices = @transform_8, window_bounds = array<i64: 1, 2>}, {transform_indices = @transform_9, window_bounds = array<i64: 16, 2>}]} {
    %c0 = arith.constant 0 : index
    %c0_0 = arith.constant 0 : index
    %0 = vector.load %arg1[%c0, %c0_0] : memref<16x32xf32, #tpu.memory_space<vmem>>, vector<16x32xf32>
    %c0_1 = arith.constant 0 : index
    %c0_2 = arith.constant 0 : index
    %1 = vector.load %arg2[%c0_1, %c0_2] : memref<32x64xf32, #tpu.memory_space<vmem>>, vector<32x64xf32>
    %cst = arith.constant dense<0.000000e+00> : vector<16x64xf32>
    %2 = tpu.matmul %0, %1, %cst {dimension_numbers = #tpu.dot_dimension_numbers<[1], [0], [0], [1], [0, 0, 1, 1], [], []>} : vector<16x32xf32>, vector<32x64xf32>, vector<16x64xf32> -> vector<16x64xf32>
    %c0_3 = arith.constant 0 : index
    %c0_4 = arith.constant 0 : index
    %3 = vector.load %arg3[%c0_3, %c0_4] : memref<1x64xf32, #tpu.memory_space<vmem>>, vector<1x64xf32>
    %4 = vector.broadcast %3 : vector<1x64xf32> to vector<16x64xf32>
    %5 = arith.addf %2, %4 : vector<16x64xf32>
    %cst_5 = arith.constant 0.000000e+00 : f32
    %6 = vector.broadcast %cst_5 : f32 to vector<16x64xf32>
    %7 = arith.maximumf %5, %6 : vector<16x64xf32>
    %c0_6 = arith.constant 0 : index
    %c0_7 = arith.constant 0 : index
    %8 = vector.load %arg4[%c0_6, %c0_7] : memref<64x64xf32, #tpu.memory_space<vmem>>, vector<64x64xf32>
    %cst_8 = arith.constant dense<0.000000e+00> : vector<16x64xf32>
    %9 = tpu.matmul %7, %8, %cst_8 {dimension_numbers = #tpu.dot_dimension_numbers<[1], [0], [0], [1], [0, 0, 1, 1], [], []>} : vector<16x64xf32>, vector<64x64xf32>, vector<16x64xf32> -> vector<16x64xf32>
    %c0_9 = arith.constant 0 : index
    %c0_10 = arith.constant 0 : index
    %10 = vector.load %arg5[%c0_9, %c0_10] : memref<1x64xf32, #tpu.memory_space<vmem>>, vector<1x64xf32>
    %11 = vector.broadcast %10 : vector<1x64xf32> to vector<16x64xf32>
    %12 = arith.addf %9, %11 : vector<16x64xf32>
    %cst_11 = arith.constant 0.000000e+00 : f32
    %13 = vector.broadcast %cst_11 : f32 to vector<16x64xf32>
    %14 = arith.maximumf %12, %13 : vector<16x64xf32>
    %c0_12 = arith.constant 0 : index
    %c0_13 = arith.constant 0 : index
    %15 = vector.load %arg6[%c0_12, %c0_13] : memref<64x32xf32, #tpu.memory_space<vmem>>, vector<64x32xf32>
    %cst_14 = arith.constant dense<0.000000e+00> : vector<16x32xf32>
    %16 = tpu.matmul %14, %15, %cst_14 {dimension_numbers = #tpu.dot_dimension_numbers<[1], [0], [0], [1], [0, 0, 1, 1], [], []>} : vector<16x64xf32>, vector<64x32xf32>, vector<16x32xf32> -> vector<16x32xf32>
    %c0_15 = arith.constant 0 : index
    %c0_16 = arith.constant 0 : index
    %17 = vector.load %arg7[%c0_15, %c0_16] : memref<1x32xf32, #tpu.memory_space<vmem>>, vector<1x32xf32>
    %18 = vector.broadcast %17 : vector<1x32xf32> to vector<16x32xf32>
    %19 = arith.addf %16, %18 : vector<16x32xf32>
    %cst_17 = arith.constant 0.000000e+00 : f32
    %20 = vector.broadcast %cst_17 : f32 to vector<16x32xf32>
    %21 = arith.maximumf %19, %20 : vector<16x32xf32>
    %c0_18 = arith.constant 0 : index
    %c0_19 = arith.constant 0 : index
    %22 = vector.load %arg8[%c0_18, %c0_19] : memref<32x2xf32, #tpu.memory_space<vmem>>, vector<32x2xf32>
    %cst_20 = arith.constant dense<0.000000e+00> : vector<16x2xf32>
    %23 = tpu.matmul %21, %22, %cst_20 {dimension_numbers = #tpu.dot_dimension_numbers<[1], [0], [0], [1], [0, 0, 1, 1], [], []>} : vector<16x32xf32>, vector<32x2xf32>, vector<16x2xf32> -> vector<16x2xf32>
    %c0_21 = arith.constant 0 : index
    %c0_22 = arith.constant 0 : index
    %24 = vector.load %arg9[%c0_21, %c0_22] : memref<1x2xf32, #tpu.memory_space<vmem>>, vector<1x2xf32>
    %25 = vector.broadcast %24 : vector<1x2xf32> to vector<16x2xf32>
    %26 = arith.addf %23, %25 : vector<16x2xf32>
    %c0_23 = arith.constant 0 : index
    %c0_24 = arith.constant 0 : index
    %27 = vector.load %arg10[%c0_23, %c0_24] : memref<16x2xf32, #tpu.memory_space<vmem>>, vector<16x2xf32>
    tpu.vector_store %arg10[%c0_23, %c0_24], %26 {strides = array<i32>} : memref<16x2xf32, #tpu.memory_space<vmem>>, vector<16x2xf32>,
    return
  }
  func.func @transform_0(%arg0: i32) -> (i32, i32) {
    %c0_i32 = arith.constant 0 : i32
    %c0_i32_0 = arith.constant 0 : i32
    return %arg0, %c0_i32 : i32, i32
  }
  func.func @transform_1(%arg0: i32) -> (i32, i32) {
    %c0_i32 = arith.constant 0 : i32
    %c0_i32_0 = arith.constant 0 : i32
    %c0_i32_1 = arith.constant 0 : i32
    return %c0_i32, %c0_i32_0 : i32, i32
  }
  func.func @transform_2(%arg0: i32) -> (i32, i32) {
    %c0_i32 = arith.constant 0 : i32
    %c0_i32_0 = arith.constant 0 : i32
    %c0_i32_1 = arith.constant 0 : i32
    return %c0_i32, %c0_i32_0 : i32, i32
  }
  func.func @transform_3(%arg0: i32) -> (i32, i32) {
    %c0_i32 = arith.constant 0 : i32
    %c0_i32_0 = arith.constant 0 : i32
    %c0_i32_1 = arith.constant 0 : i32
    return %c0_i32, %c0_i32_0 : i32, i32
  }
  func.func @transform_4(%arg0: i32) -> (i32, i32) {
    %c0_i32 = arith.constant 0 : i32
    %c0_i32_0 = arith.constant 0 : i32
    %c0_i32_1 = arith.constant 0 : i32
    return %c0_i32, %c0_i32_0 : i32, i32
  }
  func.func @transform_5(%arg0: i32) -> (i32, i32) {
    %c0_i32 = arith.constant 0 : i32
    %c0_i32_0 = arith.constant 0 : i32
    %c0_i32_1 = arith.constant 0 : i32
    return %c0_i32, %c0_i32_0 : i32, i32
  }
  func.func @transform_6(%arg0: i32) -> (i32, i32) {
    %c0_i32 = arith.constant 0 : i32
    %c0_i32_0 = arith.constant 0 : i32
    %c0_i32_1 = arith.constant 0 : i32
    return %c0_i32, %c0_i32_0 : i32, i32
  }
  func.func @transform_7(%arg0: i32) -> (i32, i32) {
    %c0_i32 = arith.constant 0 : i32
    %c0_i32_0 = arith.constant 0 : i32
    %c0_i32_1 = arith.constant 0 : i32
    return %c0_i32, %c0_i32_0 : i32, i32
  }
  func.func @transform_8(%arg0: i32) -> (i32, i32) {
    %c0_i32 = arith.constant 0 : i32
    %c0_i32_0 = arith.constant 0 : i32
    %c0_i32_1 = arith.constant 0 : i32
    return %c0_i32, %c0_i32_0 : i32, i32
  }
  func.func @transform_9(%arg0: i32) -> (i32, i32) {
    %c0_i32 = arith.constant 0 : i32
    %c0_i32_0 = arith.constant 0 : i32
    return %arg0, %c0_i32 : i32, i32
  }
}

</mosaic_0001>

<bundles_post_ra>
// kernel: tpu_custom_call.1
= control target key start
LH: loop header
LB: loop body
LE: loop exit
PB: predicated region body
PF: predicated region fallthrough
CT: control target
= control target key end

     0   :  { %14 = vsyncpa [#allocation3], 0  ;;  %s263_s12 = smov [#allocation2]   ;;  %s264_s14 = smov 128   ;;  %s417_s0 = inlined_call_operand.hbm [shape: f32[16,32], index: 0, kind: input, shape index: {}]   ;;  %s418_s1 = inlined_call_operand.vmem [shape: f32[32,64], index: 1, kind: input, shape index: {}]   ;;  %s419_s2 = inlined_call_operand.vmem [shape: f32[1,64], index: 2, kind: input, shape index: {}]   ;;  %s420_s3 = inlined_call_operand.vmem [shape: f32[64,64], index: 3, kind: input, shape index: {}]   ;;  %s421_s4 = inlined_call_operand.vmem [shape: f32[1,64], index: 4, kind: input, shape index: {}]   ;;  %s422_s5 = inlined_call_operand.vmem [shape: f32[64,32], index: 5, kind: input, shape index: {}]   ;;  %s423_s6 = inlined_call_operand.vmem [shape: f32[1,32], index: 6, kind: input, shape index: {}]   ;;  %s424_s7 = inlined_call_operand.vmem [shape: f32[32,2], index: 7, kind: input, shape index: {}]   ;;  %s425_s8 = inlined_call_operand.vmem [shape: f32[1,2], index: 8, kind: input, shape index: {}]   ;;  %s426_s9 = inlined_call_operand.vmem [shape: f32[16,2], index: 9, kind: output, shape index: {}]  }
   0x1   :  { %s19_s11 = sshll.u32 %s417_s0, 4  ;;  %s21_s13 = sshll.u32 %s263_s12, 4  ;;  %s20_s11 = int_to_ptr.hbm [resolvable:$true] %s19_s11  ;;  %s22_s13 = int_to_ptr.vmem [resolvable:$true] %s21_s13 }
   0x2   :  { %s265_s15 = smov 8  }
   0x3   :  { %27 = dma.hbm_to_vmem [thread:$0]  %s20_s11, 256, %s22_s13, [#allocation3], %s264_s14, %s264_s14, %s265_s15  }
   0x4   :  { %261 = dma.done.wait [#allocation3], 256  }
   0x5   :  { %262 = vsyncadd [#allocation3], 4294967040  ;;  %v53_v0 = vld [vmem:[%s418_s1 + $0x18] sm:$0xff]  ;;  %v52_v1 = vld [vmem:[%s418_s1 + $0x10] sm:$0xff]  ;;  %vm58_vm0 = vcmask 261120   ;;  %vm102_vm1 = vcmask 523264  }
   0x6   :  { %77 = vmatpush.msra.mxu0 %v53_v0  ;;  %v51_v2 = vld [vmem:[%s418_s1 + $0x8] sm:$0xff]  ;;  %v97_v3 = vld [vmem:[%s420_s3 + $0x38] sm:$0xff]  ;;  %v96_v4 = vld [vmem:[%s420_s3 + $0x30] sm:$0xff]  ;;  %vm214_vm2 = vcmask 15360  }
   0x7   :  { %v50_v5 = vld [vmem:[%s418_s1] sm:$0xff]  ;;  %117 = vmatpush.msra.mxu1 %v97_v3  ;;  %v95_v6 = vld [vmem:[%s420_s3 + $0x28] sm:$0xff]  ;;  %v93_v9 = vld [vmem:[%s420_s3 + $0x18] sm:$0xff] }
   0x8   :  { %78 = vmatpush.msra.mxu0 %v52_v1  ;;  %v48_v7 = vld [vmem:[#allocation2] sm:$0xff]  ;;  %v49_v10 = vld [vmem:[#allocation2 + $0x8] sm:$0xff]  ;;  %v92_v11 = vld [vmem:[%s420_s3 + $0x10] sm:$0xff] }
   0x9   :  { %118 = vmatpush.msra.mxu1 %v96_v4  ;;  %v94_v8 = vld [vmem:[%s420_s3 + $0x20] sm:$0xff]  ;;  %v91_v12 = vld [vmem:[%s420_s3 + $0x8] sm:$0xff]  ;;  %v141_v14 = vld [vmem:[%s422_s5 + $0x38] sm:$0xff] }
   0xa   :  { %79 = vmatpush.msra.mxu0 %v51_v2  ;;  %v90_v13 = vld [vmem:[%s420_s3] sm:$0xff]  ;;  %v140_v15 = vld [vmem:[%s422_s5 + $0x30] sm:$0xff]  ;;  %160 = vmatpush.msra.mxu2 %v141_v14  ;;  %v139_v16 = vld [vmem:[%s422_s5 + $0x28] sm:$0xff] }
   0xb   :  { %119 = vmatpush.msra.mxu1 %v95_v6  ;;  %v138_v17 = vld [vmem:[%s422_s5 + $0x20] sm:$0xff]  ;;  %v137_v18 = vld [vmem:[%s422_s5 + $0x18] sm:$0xff]  ;;  %v136_v26 = vld [vmem:[%s422_s5 + $0x10] sm:$0xff] }
   0xc   :  { %80 = vmatpush.msra.mxu0 %v50_v5  ;;  %161 = vmatpush.msra.mxu2 %v140_v15  ;;  %v233_v19 = vld [vmem:[%s419_s2] ss:$0 sm:$0xff]  ;;  %v135_v27 = vld [vmem:[%s422_s5 + $0x8] sm:$0xff]  ;;  %v180_v29 = vld [vmem:[%s424_s7 + $0x18] sm:$0xff] }
   0xd   :  { %222 = vmatmul.msk.f32.vlgmr.msra.gmra.mxu0 %vm58_vm0, %v48_v7  ;;  %120 = vmatpush.msra.mxu1 %v94_v8  ;;  %v134_v28 = vld [vmem:[%s422_s5] sm:$0xff]  ;;  %v179_v37 = vld [vmem:[%s424_s7 + $0x10] sm:$0xff]  ;;  %v178_v38 = vld [vmem:[%s424_s7 + $0x8] sm:$0xff] }
   0xe   :  { %162 = vmatpush.msra.mxu2 %v139_v16  ;;  %203 = vmatpush.msra.mxu3 %v180_v29  ;;  %v234_v30 = vld [vmem:[%s421_s4] ss:$0 sm:$0xff] }
   0xf   :  { %121 = vmatpush.msra.mxu1 %v93_v9  ;;  %v177_v39 = vld [vmem:[%s424_s7] sm:$0xff] }
  0x10   :  { %163 = vmatpush.msra.mxu2 %v138_v17  ;;  %204 = vmatpush.msra.mxu3 %v179_v37  ;;  %v235_v40 = vld [vmem:[%s423_s6] ss:$0 sm:$0xff] }
  0x11   :  { %122 = vmatpush.msra.mxu1 %v92_v11  ;;  %v236_v47 = vld [vmem:[%s425_s8] ss:$0 sm:$0xff] }
  0x12   :  { %164 = vmatpush.msra.mxu2 %v137_v18  ;;  %205 = vmatpush.msra.mxu3 %v178_v38 }
  0x13   :  { %123 = vmatpush.msra.mxu1 %v91_v12 }
  0x14   :  { %165 = vmatpush.msra.mxu2 %v136_v26  ;;  %206 = vmatpush.msra.mxu3 %v177_v39 }
  0x15   :  { %223 = vmatmul.msk.f32.gmra.mxu0 %vm58_vm0, %v49_v10  ;;  %124 = vmatpush.msra.mxu1 %v90_v13 }
  0x16   :  { %166 = vmatpush.msra.mxu2 %v135_v27 }
  0x18   :  { %167 = vmatpush.msra.mxu2 %v134_v28 }
  0x8a   :  { %v82_v20 = vpop.f32.mrf.mxu0 }
  0x8b   :  { %v83_v21 = vadd.f32 %v233_v19, %v82_v20 }
  0x8d   :  { %v88_v22 = vmax.f32 %v83_v21, 0.0 }
  0x8f   :  { %224 = vmatmul.msk.f32.vlgmr.msra.gmra.mxu1 %vm102_vm1, %v88_v22 }
  0x92   :  { %v85_v23 = vpop.f32.mrf.mxu0 }
  0x93   :  { %v86_v24 = vadd.f32 %v233_v19, %v85_v23 }
  0x95   :  { %v89_v25 = vmax.f32 %v86_v24, 0.0 }
  0x97   :  { %225 = vmatmul.msk.f32.gmra.mxu1 %vm102_vm1, %v89_v25 }
 0x10c   :  { %v126_v31 = vpop.f32.mrf.mxu1 }
 0x10d   :  { %v127_v32 = vadd.f32 %v234_v30, %v126_v31 }
 0x10f   :  { %v132_v33 = vmax.f32 %v127_v32, 0.0 }
 0x111   :  { %226 = vmatmul.msk.f32.vlgmr.msra.gmra.mxu2 %vm102_vm1, %v132_v33 }
 0x114   :  { %v129_v34 = vpop.f32.mrf.mxu1 }
 0x115   :  { %v130_v35 = vadd.f32 %v234_v30, %v129_v34 }
 0x117   :  { %v133_v36 = vmax.f32 %v130_v35, 0.0 }
 0x119   :  { %227 = vmatmul.msk.f32.gmra.mxu2 %vm102_vm1, %v133_v36 }
 0x194   :  { %v169_v41 = vpop.f32.mrf.mxu2 }
 0x195   :  { %v170_v42 = vadd.f32 %v235_v40, %v169_v41 }
 0x197   :  { %v175_v43 = vmax.f32 %v170_v42, 0.0 }
 0x199   :  { %228 = vmatmul.msk.f32.vlgmr.msra.gmra.mxu3 %vm58_vm0, %v175_v43 }
 0x19c   :  { %v172_v44 = vpop.f32.mrf.mxu2 }
 0x19d   :  { %v173_v45 = vadd.f32 %v235_v40, %v172_v44 }
 0x19f   :  { %v176_v46 = vmax.f32 %v173_v45, 0.0 }
 0x1a1   :  { %229 = vmatmul.msk.f32.gmra.mxu3 %vm58_vm0, %v176_v46 }
 0x21c   :  { %v208_v48 = vpop.f32.mrf.mxu3 }
 0x21d   :  { %v209_v49 = vadd.f32 %v236_v47, %v208_v48 }
 0x21f   :  { %215 = vst.msk [vmem:[%s426_s9] sm:$0xff] %vm214_vm2, %v209_v49 }
 0x224   :  { %v211_v50 = vpop.f32.mrf.mxu3 }
 0x225   :  { %v212_v51 = vadd.f32 %v236_v47, %v211_v50 }
 0x227   :  { %216 = vst.msk [vmem:[%s426_s9 + $0x8] sm:$0xff] %vm214_vm2, %v212_v51 }
 0x228   :  { %221 = vsyncpa [#allocation3], 1 }

</bundles_post_ra>
